<compile_context>
chip_gen: v7x
topology: tpu7x:2x2x1
jax: 0.10.0
libtpu: 0.0.40
codegen_flags: <defaults>
</compile_context>

<pallas_src>
import jax
import jax.numpy as jnp
from jax.experimental import pallas as pl
from jax.experimental.pallas import tpu as pltpu


def _round_up(n, m):
    return ((n + m - 1) // m) * m


# -----------------------------------------------------------------------------
# Kernel bodies.  The f32 -> matmul-dtype cast happens inside the kernel (free
# VPU work); MXU accumulates in f32; bias adds + sigmoid (EUP) stay in f32.
# -----------------------------------------------------------------------------
def net_kernel(x_ref, w1_ref, b1_ref, w2_ref, b2_ref, o_ref):
    x = x_ref[...].astype(w1_ref.dtype)
    h = jnp.dot(x, w1_ref[...], preferred_element_type=jnp.float32)
    h = jax.nn.sigmoid(h + b1_ref[...])                      # f32 activations
    q = jnp.dot(h.astype(w2_ref.dtype), w2_ref[...],
                preferred_element_type=jnp.float32) + b2_ref[...]
    o_ref[...] = q.astype(o_ref.dtype)


def _make_argmax_kernel(n_actions):
    # Fused greedy-action selection: only (Bp, 1) int32 leaves VMEM instead of
    # the padded (Bp, 128) Q slab, removing the padded-output HBM round trip
    # and the wrapper-side slice on the DQN action-selection hot path.
    neg = float(jnp.finfo(jnp.float32).min)

    def kernel(x_ref, w1_ref, b1_ref, w2_ref, b2_ref, a_ref):
        x = x_ref[...].astype(w1_ref.dtype)
        h = jnp.dot(x, w1_ref[...], preferred_element_type=jnp.float32)
        h = jax.nn.sigmoid(h + b1_ref[...])
        q = jnp.dot(h.astype(w2_ref.dtype), w2_ref[...],
                    preferred_element_type=jnp.float32) + b2_ref[...]
        lane = jax.lax.broadcasted_iota(jnp.int32, q.shape, 1)
        q = jnp.where(lane < n_actions, q, jnp.float32(neg))
        qmax = jnp.max(q, axis=1, keepdims=True)              # XLU reduce
        idx = jnp.where(q == qmax, lane, jnp.int32(q.shape[1]))
        a_ref[...] = jnp.min(idx, axis=1, keepdims=True).astype(jnp.int32)

    return kernel


# -----------------------------------------------------------------------------
# Parameter prep: zero-pad hidden/action dims to lane multiples so matmuls and
# the output store are full-lane (`vst`, not masked).  On v6e/v7x use
# lane_multiple=256 if n_hidden / n_actions ever exceed 128 (2x256x256 MXU);
# 128 is right for this tiny net and for v5e.
# -----------------------------------------------------------------------------
def pad_params(w1, b1, w2, b2, matmul_dtype=jnp.float32, lane_multiple=128):
    F, H = w1.shape
    _, A = w2.shape
    Hp = _round_up(H, lane_multiple)
    Ap = _round_up(A, lane_multiple)
    w1p = jnp.zeros((F, Hp), matmul_dtype).at[:, :H].set(w1.astype(matmul_dtype))
    b1p = jnp.zeros((1, Hp), jnp.float32).at[:, :H].set(b1.astype(jnp.float32))
    w2p = jnp.zeros((Hp, Ap), matmul_dtype).at[:H, :A].set(w2.astype(matmul_dtype))
    b2p = jnp.zeros((1, Ap), jnp.float32).at[:, :A].set(b2.astype(jnp.float32))
    return w1p, b1p, w2p, b2p


# -----------------------------------------------------------------------------
# Forward wrapper.  Returns the PADDED (Bp, Ap) Q slab; downstream DQN code
# should consume the first n_actions lanes directly (or use net_select_action)
# instead of slicing, which would re-read/write the padded slab in HBM.
#
#   batch_tile=None (default): single-shot, no grid.  Right choice on
#     single-TC v5e/v6e up to tens of thousands of rows (grid steps there are
#     purely serial overhead).
#   batch_tile=<large, e.g. 4096>: gridded path for huge batches / splitting
#     across v7x's two TensorCores (pick it so the grid length is a multiple
#     of 2 on v7x).
# -----------------------------------------------------------------------------
def net_forward(x, params, *, batch_tile=None, out_dtype=jnp.float32):
    B, F = x.shape
    w1p, b1p, w2p, b2p = params
    Hp = w1p.shape[1]
    Ap = w2p.shape[1]
    mm_item = jnp.dtype(w1p.dtype).itemsize
    out_item = jnp.dtype(out_dtype).itemsize

    if batch_tile is None or B <= batch_tile:
        row_align = 16 if mm_item < 4 else 8       # bf16 packs 16 rows / vreg
        Bp = _round_up(B, row_align)
        if Bp != B:
            x = jnp.pad(x, ((0, Bp - B), (0, 0)))
        flops = 2 * Bp * F * Hp + 2 * Bp * Hp * Ap
        bytes_accessed = int(
            x.size * x.dtype.itemsize
            + (F * Hp + Hp * Ap) * mm_item + (Hp + Ap) * 4
            + Bp * Ap * out_item)
        return pl.pallas_call(
            net_kernel,
            out_shape=jax.ShapeDtypeStruct((Bp, Ap), out_dtype),
            in_specs=[pl.BlockSpec(memory_space=pltpu.MemorySpace.VMEM)] * 5,
            out_specs=pl.BlockSpec(memory_space=pltpu.MemorySpace.VMEM),
            cost_estimate=pl.CostEstimate(
                flops=flops, transcendentals=Bp * Hp,
                bytes_accessed=bytes_accessed),
        )(x, w1p, b1p, w2p, b2p)

    # Gridded path (huge replay batches / v7x 2-TC split).  Weights stay
    # VMEM-resident across grid steps (constant index_map).  They are only
    # ~130 KiB double-buffered at Hp=Ap=128, so single-buffering them is
    # intentionally skipped for compile portability.
    tb = batch_tile
    Bp = _round_up(B, tb)
    if Bp != B:
        x = jnp.pad(x, ((0, Bp - B), (0, 0)))
    grid = Bp // tb
    # Double-buffered x/out tiles + resident weights; clamp well under the
    # v7x 32 MiB scoped VMEM default.
    needed = ((F * Hp + Hp * Ap) * mm_item + (Hp + Ap) * 4
              + 2 * tb * (F * x.dtype.itemsize + Ap * out_item))
    vmem_limit = int(min(max(2 * needed, 8 << 20), 28 << 20))
    flops = 2 * Bp * F * Hp + 2 * Bp * Hp * Ap
    bytes_accessed = int(
        Bp * F * x.dtype.itemsize
        + (F * Hp + Hp * Ap) * mm_item + (Hp + Ap) * 4
        + Bp * Ap * out_item)
    return pl.pallas_call(
        net_kernel,
        out_shape=jax.ShapeDtypeStruct((Bp, Ap), out_dtype),
        grid=(grid,),
        in_specs=[
            pl.BlockSpec((tb, F), lambda i: (i, 0)),    # x tile
            pl.BlockSpec((F, Hp), lambda i: (0, 0)),    # w1 resident
            pl.BlockSpec((1, Hp), lambda i: (0, 0)),    # b1 resident
            pl.BlockSpec((Hp, Ap), lambda i: (0, 0)),   # w2 resident
            pl.BlockSpec((1, Ap), lambda i: (0, 0)),    # b2 resident
        ],
        out_specs=pl.BlockSpec((tb, Ap), lambda i: (i, 0)),
        compiler_params=pltpu.CompilerParams(
            dimension_semantics=("parallel",),
            vmem_limit_bytes=vmem_limit),
        cost_estimate=pl.CostEstimate(
            flops=flops, transcendentals=Bp * Hp,
            bytes_accessed=bytes_accessed),
    )(x, w1p, b1p, w2p, b2p)


# -----------------------------------------------------------------------------
# Fused action selection: forward + masked argmax in one kernel; returns (B,)
# int32 greedy actions.  Small-batch / no-grid path only (DQN acting).
# -----------------------------------------------------------------------------
def net_select_action(x, params, *, n_actions):
    B, F = x.shape
    w1p, b1p, w2p, b2p = params
    Hp = w1p.shape[1]
    Ap = w2p.shape[1]
    mm_item = jnp.dtype(w1p.dtype).itemsize
    row_align = 16 if mm_item < 4 else 8
    Bp = _round_up(B, row_align)
    if Bp != B:
        x = jnp.pad(x, ((0, Bp - B), (0, 0)))
    flops = 2 * Bp * F * Hp + 2 * Bp * Hp * Ap
    bytes_accessed = int(
        x.size * x.dtype.itemsize
        + (F * Hp + Hp * Ap) * mm_item + (Hp + Ap) * 4
        + Bp * 4)
    a = pl.pallas_call(
        _make_argmax_kernel(n_actions),
        out_shape=jax.ShapeDtypeStruct((Bp, 1), jnp.int32),
        in_specs=[pl.BlockSpec(memory_space=pltpu.MemorySpace.VMEM)] * 5,
        out_specs=pl.BlockSpec(memory_space=pltpu.MemorySpace.VMEM),
        cost_estimate=pl.CostEstimate(
            flops=flops, transcendentals=Bp * Hp,
            bytes_accessed=bytes_accessed),
    )(x, w1p, b1p, w2p, b2p)
    return a[:B, 0]


# -----------------------------------------------------------------------------
# Param init mimicking torch.nn.Linear default: U(-1/sqrt(fan_in), 1/sqrt(fan_in)).
# Weights stored pre-transposed as (in, out).
# -----------------------------------------------------------------------------
def init_params(key, n_features, n_hidden, n_actions):
    k1, k2, k3, k4 = jax.random.split(key, 4)
    bound1 = 1.0 / jnp.sqrt(jnp.float32(n_features))
    bound2 = 1.0 / jnp.sqrt(jnp.float32(n_hidden))
    w1 = jax.random.uniform(k1, (n_features, n_hidden), jnp.float32, -bound1, bound1)
    b1 = jax.random.uniform(k2, (1, n_hidden), jnp.float32, -bound1, bound1)
    w2 = jax.random.uniform(k3, (n_hidden, n_actions), jnp.float32, -bound2, bound2)
    b2 = jax.random.uniform(k4, (1, n_actions), jnp.float32, -bound2, bound2)
    return w1, b1, w2, b2


def net_forward_ref(x, w1, b1, w2, b2):
    h = jax.nn.sigmoid(x @ w1 + b1)
    return h @ w2 + b2


if __name__ == "__main__":
    key = jax.random.PRNGKey(0)
    kx, kp, kb = jax.random.split(key, 3)

    batch = 8
    n_features = 8
    n_hidden = 32
    n_actions = 4

    x = jax.random.normal(kx, (batch, n_features), jnp.float32)
    w1, b1, w2, b2 = init_params(kp, n_features, n_hidden, n_actions)
    ref = net_forward_ref(x, w1, b1, w2, b2)

    # --- small-batch inference, f32 operands, no grid, padded lane-dense out ---
    p_f32 = pad_params(w1, b1, w2, b2, jnp.float32)
    out = jax.block_until_ready(net_forward(x, p_f32))
    assert out.shape[0] >= batch and out.shape[1] == 128
    assert jnp.allclose(out[:batch, :n_actions], ref, atol=1e-5, rtol=1e-5)
    assert jnp.allclose(out[:batch, n_actions:], 0.0)   # padded lanes exactly 0

    # --- bf16 matmul operands (x stays f32 in HBM; cast inside the kernel) ---
    p_bf16 = pad_params(w1, b1, w2, b2, jnp.bfloat16)
    out_bf = jax.block_until_ready(net_forward(x, p_bf16))
    assert jnp.allclose(out_bf[:batch, :n_actions], ref, atol=5e-2, rtol=5e-2)

    # --- fused greedy-action selection: argmax in-kernel, (B,) int32 result ---
    act = jax.block_until_ready(net_select_action(x, p_f32, n_actions=n_actions))
    assert act.shape == (batch,)
    assert jnp.array_equal(act, jnp.argmax(ref, axis=1).astype(jnp.int32))

    # --- gridded path: huge batch, big tile (grid of 2 for v7x), bf16 writeback ---
    big_batch = 8192
    xb = jax.random.normal(kb, (big_batch, n_features), jnp.float32)
    refb = net_forward_ref(xb, w1, b1, w2, b2)
    outb = jax.block_until_ready(
        net_forward(xb, p_f32, batch_tile=4096, out_dtype=jnp.bfloat16))
    assert outb.shape == (big_batch, 128)
    assert jnp.allclose(outb[:, :n_actions].astype(jnp.float32),
                        refb, atol=5e-2, rtol=5e-2)

    print("KERNEL_OK")
</pallas_src>

<mosaic_0001>
module attributes {stable_mosaic.version = 11 : i64} {
  func.func @net_kernel(%arg0: memref<8x8xf32, #tpu.memory_space<vmem>>, %arg1: memref<8x128xf32, #tpu.memory_space<vmem>>, %arg2: memref<1x128xf32, #tpu.memory_space<vmem>>, %arg3: memref<128x128xf32, #tpu.memory_space<vmem>>, %arg4: memref<1x128xf32, #tpu.memory_space<vmem>>, %arg5: memref<8x128xf32, #tpu.memory_space<vmem>>) attributes {dimension_semantics = [], scalar_prefetch = 0 : i64, scratch_operands = 0 : i64, tpu.core_type = #tpu.core_type<tc>} {
    %c0 = arith.constant 0 : index
    %c0_0 = arith.constant 0 : index
    %0 = vector.load %arg0[%c0, %c0_0] : memref<8x8xf32, #tpu.memory_space<vmem>>, vector<8x8xf32>
    %c0_1 = arith.constant 0 : index
    %c0_2 = arith.constant 0 : index
    %1 = vector.load %arg1[%c0_1, %c0_2] : memref<8x128xf32, #tpu.memory_space<vmem>>, vector<8x128xf32>
    %cst = arith.constant dense<0.000000e+00> : vector<8x128xf32>
    %2 = tpu.matmul %0, %1, %cst {dimension_numbers = #tpu.dot_dimension_numbers<[1], [0], [0], [1], [0, 0, 1, 1], [], []>} : vector<8x8xf32>, vector<8x128xf32>, vector<8x128xf32> -> vector<8x128xf32>
    %c0_3 = arith.constant 0 : index
    %c0_4 = arith.constant 0 : index
    %3 = vector.load %arg2[%c0_3, %c0_4] : memref<1x128xf32, #tpu.memory_space<vmem>>, vector<1x128xf32>
    %4 = vector.broadcast %3 : vector<1x128xf32> to vector<8x128xf32>
    %5 = arith.addf %2, %4 : vector<8x128xf32>
    %6 = arith.negf %5 : vector<8x128xf32>
    %7 = math.exp %6 : vector<8x128xf32>
    %cst_5 = arith.constant 1.000000e+00 : f32
    %8 = vector.broadcast %cst_5 : f32 to vector<8x128xf32>
    %9 = arith.addf %8, %7 : vector<8x128xf32>
    %10 = arith.divf %8, %9 : vector<8x128xf32>
    %c0_6 = arith.constant 0 : index
    %c0_7 = arith.constant 0 : index
    %11 = vector.load %arg3[%c0_6, %c0_7] : memref<128x128xf32, #tpu.memory_space<vmem>>, vector<128x128xf32>
    %cst_8 = arith.constant dense<0.000000e+00> : vector<8x128xf32>
    %12 = tpu.matmul %10, %11, %cst_8 {dimension_numbers = #tpu.dot_dimension_numbers<[1], [0], [0], [1], [0, 0, 1, 1], [], []>} : vector<8x128xf32>, vector<128x128xf32>, vector<8x128xf32> -> vector<8x128xf32>
    %c0_9 = arith.constant 0 : index
    %c0_10 = arith.constant 0 : index
    %13 = vector.load %arg4[%c0_9, %c0_10] : memref<1x128xf32, #tpu.memory_space<vmem>>, vector<1x128xf32>
    %14 = vector.broadcast %13 : vector<1x128xf32> to vector<8x128xf32>
    %15 = arith.addf %12, %14 : vector<8x128xf32>
    %c0_11 = arith.constant 0 : index
    %c0_12 = arith.constant 0 : index
    %16 = vector.load %arg5[%c0_11, %c0_12] : memref<8x128xf32, #tpu.memory_space<vmem>>, vector<8x128xf32>
    tpu.vector_store %arg5[%c0_11, %c0_12], %15 {strides = array<i32>} : memref<8x128xf32, #tpu.memory_space<vmem>>, vector<8x128xf32>,
    return
  }
}

</mosaic_0001>

<bundles_post_ra>
// kernel: tpu_custom_call.1
= control target key start
LH: loop header
LB: loop body
LE: loop exit
PB: predicated region body
PF: predicated region fallthrough
CT: control target
= control target key end

     0   :  { %10 = vsyncpa [#allocation3], 0  ;;  %s544_s0 = inlined_call_operand.hbm [shape: f32[8,8], index: 0, kind: input, shape index: {}]   ;;  %s545_s1 = inlined_call_operand.hbm [shape: f32[8,128], index: 1, kind: input, shape index: {}]   ;;  %s546_s2 = inlined_call_operand.vmem [shape: f32[1,128], index: 2, kind: input, shape index: {}]   ;;  %s547_s3 = inlined_call_operand.hbm [shape: f32[128,128], index: 3, kind: input, shape index: {}]   ;;  %s548_s4 = inlined_call_operand.vmem [shape: f32[1,128], index: 4, kind: input, shape index: {}]   ;;  %s549_s5 = inlined_call_operand.hbm [shape: f32[8,128], index: 5, kind: output, shape index: {}]  }
   0x1   :  { %11 = vsyncpa [#allocation6], 0 }
   0x2   :  { %12 = vsyncpa [#allocation4], 0  ;;  %s451_s18 = smov [#allocation5]   ;;  %s452_s20 = smov [#allocation2]  }
   0x3   :  { %s29_s19 = sshll.u32 %s451_s18, 4  ;;  %s19_s21 = sshll.u32 %s452_s20, 4  ;;  %s30_s19 = int_to_ptr.vmem [resolvable:$true] %s29_s19  ;;  %s20_s21 = int_to_ptr.vmem [resolvable:$true] %s19_s21 }
   0x4   :  { %s357_s24 = scalar_lea.hbm %s545_s1, 128 }
   0x5   :  { %p358_p0 = scmp.ne.s32.totalorder %s545_s1, %s357_s24  ;;  %p361_p1 = scmp.lt.u32.totalorder %s357_s24, %s545_s1 }
   0x7   :  { %p363_p2 = pnand %p361_p1, %p358_p0 }
   0x9   :  { %366 = shalt.err (!%p363_p2)
}
   0xa   :  { %s367_s29 = scalar_lea.vmem %s30_s19, 128  ;;  %p372_p4 = scmp.lt.s32.totalorder %s30_s19, %s30_s19 }
   0xb   :  { %p368_p3 = scmp.ne.s32.totalorder %s30_s19, %s367_s29  ;;  %p373_p5 = scmp.lt.s32.totalorder %s367_s29, %s367_s29 }
   0xd   :  { %p374_p6 = por %p373_p5, %p372_p4 }
   0xf   :  { %p375_p7 = pnand %p374_p6, %p368_p3 }
  0x11   :  { %378 = shalt.err (!%p375_p7)
}
  0x12   :  { %32 = dma.hbm_to_vmem [thread:$0]  %s545_s1, 128, %s30_s19, [#allocation6]  }
  0x13   :  { %s379_s9 = scalar_lea.hbm %s544_s0, 128 }
  0x14   :  { %p380_p8 = scmp.ne.s32.totalorder %s544_s0, %s379_s9  ;;  %p383_p9 = scmp.lt.u32.totalorder %s379_s9, %s544_s0 }
  0x16   :  { %p385_p10 = pnand %p383_p9, %p380_p8 }
  0x18   :  { %388 = shalt.err (!%p385_p10)
}
  0x19   :  { %s389_s14 = scalar_lea.vmem %s20_s21, 128  ;;  %p394_p12 = scmp.lt.s32.totalorder %s20_s21, %s20_s21 }
  0x1a   :  { %p390_p11 = scmp.ne.s32.totalorder %s20_s21, %s389_s14  ;;  %p395_p13 = scmp.lt.s32.totalorder %s389_s14, %s389_s14 }
  0x1c   :  { %p396_p0 = por %p395_p13, %p394_p12 }
  0x1e   :  { %p397_p1 = pnand %p396_p0, %p390_p11 }
  0x20   :  { %400 = shalt.err (!%p397_p1)
}
  0x21   :  { %22 = dma.hbm_to_vmem [thread:$0]  %s544_s0, 128, %s20_s21, [#allocation3]  }
  0x22   :  { %s453_s16 = smov [#allocation7]   ;;  %s401_s20 = scalar_lea.hbm %s547_s3, 2048 }
  0x23   :  { %s40_s17 = sshll.u32 %s453_s16, 4  ;;  %p402_p2 = scmp.ne.s32.totalorder %s547_s3, %s401_s20  ;;  %s41_s17 = int_to_ptr.vmem [resolvable:$true] %s40_s17 }
  0x24   :  { %p405_p3 = scmp.lt.u32.totalorder %s401_s20, %s547_s3 }
  0x26   :  { %p407_p4 = pnand %p405_p3, %p402_p2 }
  0x28   :  { %410 = shalt.err (!%p407_p4)
}
  0x29   :  { %s411_s26 = scalar_lea.vmem %s41_s17, 2048  ;;  %p416_p6 = scmp.lt.s32.totalorder %s41_s17, %s41_s17 }
  0x2a   :  { %p412_p5 = scmp.ne.s32.totalorder %s41_s17, %s411_s26  ;;  %p417_p7 = scmp.lt.s32.totalorder %s411_s26, %s411_s26 }
  0x2c   :  { %p418_p8 = por %p417_p7, %p416_p6 }
  0x2e   :  { %p419_p9 = pnand %p418_p8, %p412_p5 }
  0x30   :  { %422 = shalt.err (!%p419_p9)
}
  0x31   :  { %s454_s0 = smov 128   ;;  %s455_s21 = smov 8  }
  0x32   :  { %46 = dma.hbm_to_vmem [thread:$0]  %s547_s3, 2048, %s41_s17, [#allocation6], %s454_s0, %s454_s0, %s455_s21  }
  0x33   :  { %445 = dma.done.wait [#allocation3], 128  }
  0x34   :  { %446 = vsyncadd [#allocation3], 4294967168 }
  0x35   :  { %447 = dma.done.wait [#allocation6], 2176  }
  0x36   :  { %448 = vsyncadd [#allocation6], 4294965120  ;;  %v456_v0 = vmov 0.0   ;;  %vm457_vm0 = vmmov 0   ;;  %v458_v1 = vmov 0.0|0.0   ;;  %vm67_vm1 = vcmask 64512  }
  0x37   :  { %280 = vmatprep.subr.mxu0 %v456_v0  ;;  %282 = vmatprep.mubr.msk.f32.mxu0 %vm457_vm0, %v456_v0  ;;  %v59_v2 = vld [vmem:[#allocation5] sm:$0xff]  ;;  %v58_v3 = vld [vmem:[#allocation2] sm:$0xff]  ;;  %v147_v4 = vld [vmem:[#allocation7] sm:$0xff]  ;;  %s459_s7 = smov [#allocation8]  }
  0x38   :  { %320 = vmatprep.subr.bf16.mxu1 %v458_v1  ;;  %317 = vmatprep.mubr.msk.f32.mxu1 %vm457_vm0, %v456_v0  ;;  %v148_v5 = vld [vmem:[#allocation7 + $0x8] sm:$0xff]  ;;  %v149_v7 = vld [vmem:[#allocation7 + $0x10] sm:$0xff]  ;;  %v150_v8 = vld [vmem:[#allocation7 + $0x18] sm:$0xff]  ;;  %s247_s8 = sshll.u32 %s459_s7, 4  ;;  %s248_s8 = int_to_ptr.vmem [resolvable:$true] %s247_s8 }
  0x39   :  { %281 = vmatpush3.msra.mxu0 %v59_v2  ;;  %v321_v6 = vpack.c.bf16 %v148_v5, %v147_v4  ;;  %v324_v9 = vpack.c.bf16 %v150_v8, %v149_v7  ;;  %v151_v10 = vld [vmem:[#allocation7 + $0x20] sm:$0xff]  ;;  %v152_v11 = vld [vmem:[#allocation7 + $0x28] sm:$0xff]  ;;  %v153_v13 = vld [vmem:[#allocation7 + $0x30] sm:$0xff]  ;;  %p428_p11 = scmp.lt.s32.totalorder %s248_s8, %s248_s8 }
  0x3a   :  { %283 = vmatmul.mubr.msk.f32.vlgmr.msra.gmra.mrb[0].mxu0 %vm67_vm1, %v58_v3  ;;  %v327_v12 = vpack.c.bf16 %v152_v11, %v151_v10  ;;  %v154_v14 = vld [vmem:[#allocation7 + $0x38] sm:$0xff]  ;;  %v155_v16 = vld [vmem:[#allocation7 + $0x40] sm:$0xff]  ;;  %v156_v17 = vld [vmem:[#allocation7 + $0x48] sm:$0xff] }
  0x3b   :  { %322 = vmatpush3.bf16.msra.mxu1 %v321_v6  ;;  %v330_v15 = vpack.c.bf16 %v154_v14, %v153_v13  ;;  %v333_v18 = vpack.c.bf16 %v156_v17, %v155_v16  ;;  %v157_v19 = vld [vmem:[#allocation7 + $0x50] sm:$0xff]  ;;  %v158_v20 = vld [vmem:[#allocation7 + $0x58] sm:$0xff]  ;;  %v159_v22 = vld [vmem:[#allocation7 + $0x60] sm:$0xff] }
  0x3c   :  { %323 = vmatprep.subr.bf16.mxu1 %v458_v1  ;;  %v336_v21 = vpack.c.bf16 %v158_v20, %v157_v19  ;;  %v160_v23 = vld [vmem:[#allocation7 + $0x68] sm:$0xff]  ;;  %v161_v25 = vld [vmem:[#allocation7 + $0x70] sm:$0xff]  ;;  %v162_v26 = vld [vmem:[#allocation7 + $0x78] sm:$0xff] }
  0x3d   :  { %v339_v24 = vpack.c.bf16 %v160_v23, %v159_v22  ;;  %v342_v27 = vpack.c.bf16 %v162_v26, %v161_v25  ;;  %v257_v28 = vld [vmem:[%s546_s2] ss:$0 sm:$0xff]  ;;  %s423_s2 = scalar_lea.vmem %s248_s8, 128 }
  0x3e   :  { %v260_v36 = vld [vmem:[%s548_s4] ss:$0 sm:$0xff]  ;;  %p424_p10 = scmp.ne.s32.totalorder %s248_s8, %s423_s2  ;;  %p429_p12 = scmp.lt.s32.totalorder %s423_s2, %s423_s2 }
  0x3f   :  { %325 = vmatpush3.bf16.msra.mxu1 %v324_v9 }
  0x40   :  { %326 = vmatprep.subr.bf16.mxu1 %v458_v1  ;;  %p430_p13 = por %p429_p12, %p428_p11 }
  0x42   :  { %p431_p0 = pnand %p430_p13, %p424_p10 }
  0x43   :  { %328 = vmatpush3.bf16.msra.mxu1 %v327_v12 }
  0x44   :  { %329 = vmatprep.subr.bf16.mxu1 %v458_v1 }
  0x47   :  { %331 = vmatpush3.bf16.msra.mxu1 %v330_v15 }
  0x48   :  { %332 = vmatprep.subr.bf16.mxu1 %v458_v1 }
  0x4b   :  { %334 = vmatpush3.bf16.msra.mxu1 %v333_v18 }
  0x4c   :  { %335 = vmatprep.subr.bf16.mxu1 %v458_v1 }
  0x4f   :  { %337 = vmatpush3.bf16.msra.mxu1 %v336_v21 }
  0x50   :  { %338 = vmatprep.subr.bf16.mxu1 %v458_v1 }
  0x53   :  { %340 = vmatpush3.bf16.msra.mxu1 %v339_v24 }
  0x54   :  { %341 = vmatprep.subr.bf16.mxu1 %v458_v1 }
  0x57   :  { %343 = vmatpush3.bf16.msra.mxu1 %v342_v27 }
 0x10d   :  { %v137_v29 = vpop.f32.mrb[0].mxu0 }
 0x10e   :  { %v138_v30 = vadd.f32 %v257_v28, %v137_v29  ;;  %v284_v31 = vpop.f32.mrb[1].mxu0 }
 0x110   :  { %v259_v32 = vmul.f32 -1.442695, %v138_v30 }
 0x112   :  { %353 = vpow2.f32 %v259_v32 }
 0x11c   :  { %v354_v33 = vpop.eup %353 }
 0x11d   :  { %v144_v34 = vadd.f32 1.0, %v354_v33 }
 0x11f   :  { %355 = vrcp.f32 %v144_v34 }
 0x129   :  { %v356_v35 = vpop.eup %355 }
 0x12a   :  { %318 = vmatmul.mubr.f32.vlgmr.msra.gmra.mrb[0].mxu1 %v356_v35 }
 0x1fd   :  { %v236_v37 = vpop.f32.mrb[0].mxu1 }
 0x1fe   :  { %v237_v38 = vadd.f32 %v260_v36, %v236_v37  ;;  %v319_v39 = vpop.f32.mrb[1].mxu1 }
 0x200   :  { %240 = vst [vmem:[#allocation8] sm:$0xff] %v237_v38 }
 0x201   :  { %434 = shalt.err (!%p431_p0)
}
 0x202   :  { %s435_s11 = scalar_lea.hbm %s549_s5, 128 }
 0x203   :  { %p436_p1 = scmp.ne.s32.totalorder %s549_s5, %s435_s11  ;;  %p439_p2 = scmp.lt.u32.totalorder %s435_s11, %s549_s5 }
 0x205   :  { %p441_p3 = pnand %p439_p2, %p436_p1 }
 0x207   :  { %444 = shalt.err (!%p441_p3)
}
 0x208   :  { %250 = dma.vmem_to_hbm [thread:$0]  %s248_s8, 128, %s549_s5, [#allocation4]  }
 0x209   :  { %449 = dma.done.wait [#allocation4], 128  }
 0x20a   :  { %450 = vsyncadd [#allocation4], 4294967168 }
 0x20b   :  { %254 = vsyncpa [#allocation3], 1 }
 0x20c   :  { %255 = vsyncpa [#allocation6], 1 }
 0x20d   :  { %256 = vsyncpa [#allocation4], 1 }

</bundles_post_ra>
